<compile_context>
chip_gen: v7x
topology: tpu7x:2x2x1
jax: 0.10.0
libtpu: 0.0.40
codegen_flags: <defaults>
</compile_context>

<pallas_src>
import jax
import jax.numpy as jnp
import numpy as np
from jax.experimental import pallas as pl
from jax.experimental.pallas import tpu as pltpu

IMAGE_RGB_MEAN = [0.485, 0.456, 0.406]
IMAGE_RGB_STD = [0.229, 0.224, 0.225]


def _rgb_kernel(x_ref, scale_ref, bias_ref, o_ref):
    # x_ref: (tile_r, tile_hw); scale_ref/bias_ref: (tile_r, 1) broadcast along lanes.
    o_ref[...] = x_ref[...] * scale_ref[...] + bias_ref[...]


def _choose_tiles(rows, hw, itemsize, target_bytes=4 << 20):
    """Pick a (tile_r, tile_hw) block of ~target_bytes that satisfies the
    (8, 128) tiling rule (multiple-of or full-dim on the last two axes)."""
    if 8 * hw * itemsize <= target_bytes:
        tile_hw = hw  # full lane dim -> always legal, lane-dense if hw % 128 == 0
    else:
        tile_hw = max(128, (target_bytes // (8 * itemsize)) // 128 * 128)
    if rows <= 8:
        tile_r = rows  # equals full dim -> legal
    else:
        per_row = max(1, tile_hw * itemsize)
        tile_r = max(8, (min(rows, target_bytes // per_row) // 8) * 8)
    return tile_r, tile_hw


def rgb_normalize(x, scale_c, bias_c):
    """x: (N, C, H, W); scale_c = 1/std, bias_c = -mean/std, both shape (C,)."""
    N, C, H, W = x.shape
    rows, hw = N * C, H * W

    # Free reshape of contiguous dims -> lane-dense 2-D slab.
    x2 = x.reshape(rows, hw)
    # Per-row (= per image-channel) scale/bias; row = n*C + c -> channel c = row % C.
    scale_r = jnp.tile(scale_c.astype(x.dtype), N).reshape(rows, 1)
    bias_r = jnp.tile(bias_c.astype(x.dtype), N).reshape(rows, 1)

    tile_r, tile_hw = _choose_tiles(rows, hw, x.dtype.itemsize)
    grid = (pl.cdiv(rows, tile_r), pl.cdiv(hw, tile_hw))

    out = pl.pallas_call(
        _rgb_kernel,
        out_shape=jax.ShapeDtypeStruct((rows, hw), x.dtype),
        grid=grid,
        in_specs=[
            pl.BlockSpec((tile_r, tile_hw), lambda i, j: (i, j)),
            pl.BlockSpec((tile_r, 1), lambda i, j: (i, 0)),
            pl.BlockSpec((tile_r, 1), lambda i, j: (i, 0)),
        ],
        out_specs=pl.BlockSpec((tile_r, tile_hw), lambda i, j: (i, j)),
        compiler_params=pltpu.CompilerParams(
            dimension_semantics=("parallel", "parallel"),
            vmem_limit_bytes=32 * 1024 * 1024,
        ),
    )(x2, scale_r, bias_r)
    return out.reshape(N, C, H, W)


class RGB:
    """JAX/Pallas port of the PyTorch RGB normalization module."""

    def __init__(self, model_name="resnet34"):
        # mean_std(): pretrainedmodels unavailable -> ImageNet fallback stats.
        self.mean = jnp.asarray(IMAGE_RGB_MEAN, dtype=jnp.float32)
        self.std = jnp.asarray(IMAGE_RGB_STD, dtype=jnp.float32)
        # Hoisted out of the kernel: exact (not approx) reciprocal, so results
        # match the per-element divide to within a couple of ulps.
        self.scale = 1.0 / self.std
        self.bias = -self.mean / self.std

    def __call__(self, x):
        return rgb_normalize(x, self.scale, self.bias)


if __name__ == "__main__":
    key = jax.random.PRNGKey(0)
    N, C, H, W = 2, 3, 16, 16
    x = jax.random.uniform(key, (N, C, H, W), dtype=jnp.float32)

    model = RGB("resnet34")
    out = jax.block_until_ready(model(x))

    # Reference mirrors the torch broadcasting over (1, 3, 1, 1).
    ref = (x - model.mean.reshape(1, 3, 1, 1)) / model.std.reshape(1, 3, 1, 1)
    np.testing.assert_allclose(np.asarray(out), np.asarray(ref), rtol=1e-6, atol=1e-6)

    print("KERNEL_OK")
</pallas_src>

<mosaic_0001>
module attributes {stable_mosaic.version = 11 : i64} {
  func.func @_rgb_kernel(%arg0: i32, %arg1: i32, %arg2: memref<6x256xf32, #tpu.memory_space<vmem>>, %arg3: memref<6x1xf32, #tpu.memory_space<vmem>>, %arg4: memref<6x1xf32, #tpu.memory_space<vmem>>, %arg5: memref<6x256xf32, #tpu.memory_space<vmem>>) attributes {dimension_semantics = [#tpu.dimension_semantics<parallel>, #tpu.dimension_semantics<parallel>], iteration_bounds = array<i64: 1, 1>, scalar_prefetch = 0 : i64, scratch_operands = 0 : i64, tpu.core_type = #tpu.core_type<tc>, window_params = [{transform_indices = @transform_0, window_bounds = array<i64: 6, 256>}, {transform_indices = @transform_1, window_bounds = array<i64: 6, 1>}, {transform_indices = @transform_2, window_bounds = array<i64: 6, 1>}, {transform_indices = @transform_3, window_bounds = array<i64: 6, 256>}]} {
    %c0 = arith.constant 0 : index
    %c0_0 = arith.constant 0 : index
    %0 = vector.load %arg2[%c0, %c0_0] : memref<6x256xf32, #tpu.memory_space<vmem>>, vector<6x256xf32>
    %c0_1 = arith.constant 0 : index
    %c0_2 = arith.constant 0 : index
    %1 = vector.load %arg3[%c0_1, %c0_2] : memref<6x1xf32, #tpu.memory_space<vmem>>, vector<6x1xf32>
    %2 = vector.broadcast %1 : vector<6x1xf32> to vector<6x256xf32>
    %3 = arith.mulf %0, %2 : vector<6x256xf32>
    %c0_3 = arith.constant 0 : index
    %c0_4 = arith.constant 0 : index
    %4 = vector.load %arg4[%c0_3, %c0_4] : memref<6x1xf32, #tpu.memory_space<vmem>>, vector<6x1xf32>
    %5 = vector.broadcast %4 : vector<6x1xf32> to vector<6x256xf32>
    %6 = arith.addf %3, %5 : vector<6x256xf32>
    %c0_5 = arith.constant 0 : index
    %c0_6 = arith.constant 0 : index
    %7 = vector.load %arg5[%c0_5, %c0_6] : memref<6x256xf32, #tpu.memory_space<vmem>>, vector<6x256xf32>
    tpu.vector_store %arg5[%c0_5, %c0_6], %6 {strides = array<i32>} : memref<6x256xf32, #tpu.memory_space<vmem>>, vector<6x256xf32>,
    return
  }
  func.func @transform_0(%arg0: i32, %arg1: i32) -> (i32, i32) {
    %c0_i32 = arith.constant 0 : i32
    return %arg0, %arg1 : i32, i32
  }
  func.func @transform_1(%arg0: i32, %arg1: i32) -> (i32, i32) {
    %c0_i32 = arith.constant 0 : i32
    %c0_i32_0 = arith.constant 0 : i32
    return %arg0, %c0_i32 : i32, i32
  }
  func.func @transform_2(%arg0: i32, %arg1: i32) -> (i32, i32) {
    %c0_i32 = arith.constant 0 : i32
    %c0_i32_0 = arith.constant 0 : i32
    return %arg0, %c0_i32 : i32, i32
  }
  func.func @transform_3(%arg0: i32, %arg1: i32) -> (i32, i32) {
    %c0_i32 = arith.constant 0 : i32
    return %arg0, %arg1 : i32, i32
  }
}

</mosaic_0001>

<bundles_post_ra>
// kernel: tpu_custom_call.1
= control target key start
LH: loop header
LB: loop body
LE: loop exit
PB: predicated region body
PF: predicated region fallthrough
CT: control target
= control target key end

     0   :  { %v76_v1 = vmov 0   ;;  %s122_s0 = inlined_call_operand.vmem [shape: f32[6,256], index: 0, kind: input, shape index: {}]   ;;  %s123_s1 = inlined_call_operand.vmem [shape: f32[6,1], index: 1, kind: input, shape index: {}]   ;;  %s124_s2 = inlined_call_operand.vmem [shape: f32[6,1], index: 2, kind: input, shape index: {}]   ;;  %s125_s3 = inlined_call_operand.hbm [shape: f32[6,256], index: 3, kind: output, shape index: {}]  }
   0x1   :  { %v17_v0 = vld [vmem:[%s123_s1] sm:$0x3f]  ;;  %51 = vset.pattern.permute.xlu0 %v76_v1 }
   0x2   :  { %8 = vsyncpa [#allocation3], 0  ;;  %20 = vperm.xlu0 %51, %v17_v0   ;;  %v25_v2 = vld [vmem:[%s124_s2] sm:$0x3f]  ;;  %v16_v5 = vld [vmem:[%s122_s0 + $0x8] sm:$0x3f] }
   0x3   :  { %v15_v4 = vld [vmem:[%s122_s0] sm:$0x3f]  ;;  %s77_s20 = smov [#allocation2]  }
   0x4   :  { %s41_s1 = sshll.u32 %s77_s20, 4  ;;  %s42_s1 = int_to_ptr.vmem [resolvable:$true] %s41_s1 }
   0x5   :  { %s52_s2 = scalar_lea.vmem %s42_s1, 256  ;;  %p57_p1 = scmp.lt.s32.totalorder %s42_s1, %s42_s1 }
   0x6   :  { %28 = vperm.xlu0 %51, %v25_v2   ;;  %p53_p0 = scmp.ne.s32.totalorder %s42_s1, %s52_s2  ;;  %p58_p2 = scmp.lt.s32.totalorder %s52_s2, %s52_s2 }
   0x8   :  { %p59_p3 = por %p58_p2, %p57_p1 }
   0xa   :  { %p60_p4 = pnand %p59_p3, %p53_p0 }
  0x81   :  { %v21_v3 = vpop.permute.xlu0 %20 }
  0x82   :  { %v23_v6 = vmul.f32 %v21_v3, %v15_v4  ;;  %v24_v7 = vmul.f32 %v21_v3, %v16_v5 }
  0x85   :  { %v29_v8 = vpop.permute.xlu0 %28 }
  0x86   :  { %v31_v9 = vadd.f32 %v29_v8, %v23_v6  ;;  %v32_v10 = vadd.f32 %v29_v8, %v24_v7 }
  0x88   :  { %33 = vst [vmem:[#allocation2] sm:$0x3f] %v31_v9  ;;  %34 = vst [vmem:[#allocation2 + $0x8] sm:$0x3f] %v32_v10 }
  0x89   :  { %63 = shalt.err (!%p60_p4)
}
  0x8a   :  { %s64_s0 = scalar_lea.hbm %s125_s3, 256 }
  0x8b   :  { %p65_p5 = scmp.ne.s32.totalorder %s125_s3, %s64_s0  ;;  %p68_p6 = scmp.lt.u32.totalorder %s64_s0, %s125_s3 }
  0x8d   :  { %p70_p7 = pnand %p68_p6, %p65_p5 }
  0x8f   :  { %73 = shalt.err (!%p70_p7)
}
  0x90   :  { %44 = dma.vmem_to_hbm [thread:$0]  %s42_s1, 256, %s125_s3, [#allocation3]  }
  0x91   :  { %74 = dma.done.wait [#allocation3], 256  }
  0x92   :  { %75 = vsyncadd [#allocation3], 4294967040 }
  0x93   :  { %48 = vsyncpa [#allocation3], 1 }

</bundles_post_ra>
